<compile_context>
chip_gen: v7x
topology: tpu7x:2x2x1
jax: 0.10.0
libtpu: 0.0.40
codegen_flags: <defaults>
</compile_context>

<pallas_src>
import jax
import jax.numpy as jnp
from jax.experimental import pallas as pl
from jax.experimental.pallas import tpu as pltpu

_VPU_CHANNEL_MAX = 16  # below this, skip the MXU (heavy padding waste); use VPU FMAs


def _residual_pointwise_kernel(x_ref, w_ref, b_ref, o_ref):
    """o = W@x + b + x as fully vectorized VPU FMAs (tiny C).

    x_ref / o_ref : (Nb, C, T) VMEM  (channels on sublanes, spatial on lanes)
    w_ref         : (C, C) VMEM  (resident across the grid)
    b_ref         : (C, 1) VMEM  (resident)
    """
    Nb, C, _ = x_ref.shape
    for n in range(Nb):                     # static unroll, Nb is small
        x = x_ref[n]                        # ONE full-tile load: (C, T)
        acc = x + b_ref[...]                # residual + bias on all C sublanes at once
        for ci in range(C):                 # static unroll, C tiny
            # (C,1) weight column * (1,T) input row -> (C,T); fills all sublanes
            acc = acc + w_ref[:, ci:ci + 1] * x[ci:ci + 1, :]
        o_ref[n] = acc.astype(o_ref.dtype)  # ONE unmasked full-tile store


def _residual_matmul_kernel(x_ref, w_ref, b_ref, o_ref):
    """MXU path for realistic channel counts (C >= _VPU_CHANNEL_MAX).

    x_ref / o_ref : (Nb, C, T) VMEM
    w_ref         : (C, C) VMEM (resident across the grid)
    b_ref         : (C, 1) VMEM (resident)
    """
    Nb = x_ref.shape[0]
    for n in range(Nb):
        x = x_ref[n]                                                # (C, T)
        y = jnp.dot(w_ref[...], x, preferred_element_type=jnp.float32)
        o_ref[n] = (y + b_ref[...] + x).astype(o_ref.dtype)


def _choose_blocking(N, C, HW, itemsize, target_block_bytes):
    """Pick (Nb, tile_cols) so one block is ~target bytes, tiles evenly, and
    the grid has >=2 iterations whenever possible (v7x 2-TC sharding)."""
    # Spatial tile: largest divisor of HW that is a multiple of 128 (or HW
    # itself, always legal as a full-extent block) within the byte target.
    cands = sorted({d for d in range(128, HW, 128) if HW % d == 0} | {HW})
    fitting = [d for d in cands if C * d * itemsize <= target_block_bytes]
    tile_cols = max(fitting) if fitting else min(cands)
    # TODO(synk): masked tail handling (pl.BoundedSlice / masked last tile) for
    # spatial extents with no friendly divisor, so block size can always be capped.

    # Batch blocking: only when the whole spatial extent fits in one block so
    # each per-step DMA stays a contiguous multi-row transfer.
    Nb = 1
    if tile_cols == HW:
        per_batch = C * HW * itemsize
        max_nb = max(1, target_block_bytes // per_batch)
        for d in range(min(N, max_nb), 0, -1):
            if N % d == 0:
                Nb = d
                break

    # Guarantee >=2 parallel grid steps when the problem allows it.
    if (N // Nb) * (HW // tile_cols) < 2:
        if N >= 2:
            for d in range(N // 2, 0, -1):      # split the batch axis
                if N % d == 0:
                    Nb = d
                    break
        else:
            smaller = [d for d in cands if d < tile_cols]
            if smaller:                          # split the spatial axis
                tile_cols = max(smaller)
    return Nb, tile_cols


def residual_conv1x1(x_nchw, w, b):
    """Pallas Residual(Conv1x1)(x) for NCHW input, no host-side transposes.

    x_nchw : (N, C, H, W) float32
    w      : (C_out, C_in) 1x1-conv weight (C_out == C_in == C)
    b      : (C,) bias
    """
    N, C, H, W = x_nchw.shape
    HW = H * W
    itemsize = x_nchw.dtype.itemsize

    # Generation-aware VMEM budget: scoped limit = 3/4 of physical capacity
    # (headroom below v7x's 64 MiB), never below 32 MiB (raises v5e's 16 MiB
    # default); larger per-block byte target on 128 MiB (v5e/v6e) parts.
    try:
        vmem_cap = int(pltpu.get_tpu_info().vmem_capacity_bytes)
    except Exception:  # pragma: no cover - conservative fallback
        vmem_cap = 64 << 20
    scoped_cap = max(32 << 20, (vmem_cap * 3) // 4)
    target_block_bytes = (8 << 20) if vmem_cap >= (96 << 20) else (4 << 20)

    Nb, tile_cols = _choose_blocking(N, C, HW, itemsize, target_block_bytes)
    assert N % Nb == 0 and HW % tile_cols == 0
    grid = (N // Nb, HW // tile_cols)

    block_bytes = Nb * C * tile_cols * itemsize
    needed = 4 * block_bytes + (C * C + C) * w.dtype.itemsize  # 2x-buffered in+out + params
    vmem_limit = int(min(scoped_cap, max(32 << 20, needed * 5 // 4)))

    x3d = x_nchw.reshape(N, C, HW)                 # free view, no data movement

    data_spec = pl.BlockSpec((Nb, C, tile_cols), lambda n, s: (n, 0, s))
    w_spec = pl.BlockSpec((C, C), lambda n, s: (0, 0))   # resident weight
    b_spec = pl.BlockSpec((C, 1), lambda n, s: (0, 0))   # resident bias

    kernel = (_residual_pointwise_kernel if C <= _VPU_CHANNEL_MAX
              else _residual_matmul_kernel)

    out3d = pl.pallas_call(
        kernel,
        out_shape=jax.ShapeDtypeStruct((N, C, HW), x_nchw.dtype),
        grid_spec=pltpu.PrefetchScalarGridSpec(
            num_scalar_prefetch=0,
            grid=grid,
            in_specs=[data_spec, w_spec, b_spec],
            out_specs=data_spec,
        ),
        compiler_params=pltpu.CompilerParams(
            dimension_semantics=("parallel", "parallel"),  # megacore / 2-TC sharding
            vmem_limit_bytes=vmem_limit,
        ),
    )(x3d, w, b.reshape(C, 1))

    return out3d.reshape(N, C, H, W)               # free view back to NCHW


if __name__ == "__main__":
    key = jax.random.PRNGKey(0)
    kx, kw, kb = jax.random.split(key, 3)

    # --- main demo: tiny synthetic shapes (vectorized VPU path) ------------
    N, C, H, W = 2, 4, 16, 16
    x = jax.random.normal(kx, (N, C, H, W), dtype=jnp.float32)
    w = jax.random.normal(kw, (C, C), dtype=jnp.float32) * 0.1
    b = jax.random.normal(kb, (C,), dtype=jnp.float32) * 0.1

    out = jax.block_until_ready(residual_conv1x1(x, w, b))

    ref = jnp.einsum("nchw,oc->nohw", x, w) + b[None, :, None, None] + x
    assert out.shape == x.shape and out.dtype == x.dtype
    assert jnp.allclose(out, ref, atol=1e-5, rtol=1e-5), "mismatch vs reference (VPU path)"

    # --- also exercise the MXU path (realistic channel count) --------------
    C2 = 128
    x2 = jax.random.normal(kx, (1, C2, 16, 16), dtype=jnp.float32)
    w2 = jax.random.normal(kw, (C2, C2), dtype=jnp.float32) * 0.05
    b2 = jax.random.normal(kb, (C2,), dtype=jnp.float32) * 0.1

    out2 = jax.block_until_ready(residual_conv1x1(x2, w2, b2))
    ref2 = (
        jnp.einsum("nchw,oc->nohw", x2, w2, precision=jax.lax.Precision.HIGHEST)
        + b2[None, :, None, None]
        + x2
    )
    assert jnp.allclose(out2, ref2, atol=1e-3, rtol=1e-3), "mismatch vs reference (MXU path)"

    print("KERNEL_OK")
</pallas_src>

<mosaic_0001>
module attributes {stable_mosaic.version = 11 : i64} {
  func.func @_residual_pointwise_kernel(%arg0: i32, %arg1: i32, %arg2: memref<1x4x256xf32, #tpu.memory_space<vmem>>, %arg3: memref<4x4xf32, #tpu.memory_space<vmem>>, %arg4: memref<4x1xf32, #tpu.memory_space<vmem>>, %arg5: memref<1x4x256xf32, #tpu.memory_space<vmem>>) attributes {dimension_semantics = [#tpu.dimension_semantics<parallel>, #tpu.dimension_semantics<parallel>], iteration_bounds = array<i64: 2, 1>, scalar_prefetch = 0 : i64, scratch_operands = 0 : i64, tpu.core_type = #tpu.core_type<tc>, window_params = [{transform_indices = @transform_0, window_bounds = array<i64: 1, 4, 256>}, {pipeline_mode = #tpu.pipeline_mode<synchronous>, transform_indices = @transform_1, window_bounds = array<i64: 4, 4>}, {pipeline_mode = #tpu.pipeline_mode<synchronous>, transform_indices = @transform_2, window_bounds = array<i64: 4, 1>}, {transform_indices = @transform_3, window_bounds = array<i64: 1, 4, 256>}]} {
    %c0 = arith.constant 0 : index
    %c0_0 = arith.constant 0 : index
    %c0_1 = arith.constant 0 : index
    %0 = vector.load %arg2[%c0, %c0_0, %c0_1] : memref<1x4x256xf32, #tpu.memory_space<vmem>>, vector<1x4x256xf32>
    %1 = vector.shape_cast %0 : vector<1x4x256xf32> to vector<4x256xf32>
    %c0_2 = arith.constant 0 : index
    %c0_3 = arith.constant 0 : index
    %2 = vector.load %arg4[%c0_2, %c0_3] : memref<4x1xf32, #tpu.memory_space<vmem>>, vector<4x1xf32>
    %3 = vector.broadcast %2 : vector<4x1xf32> to vector<4x256xf32>
    %4 = arith.addf %1, %3 : vector<4x256xf32>
    %c0_4 = arith.constant 0 : index
    %c0_5 = arith.constant 0 : index
    %5 = vector.load %arg3[%c0_4, %c0_5] : memref<4x4xf32, #tpu.memory_space<vmem>>, vector<4x1xf32>
    %6 = vector.extract_strided_slice %1 {offsets = [0, 0], sizes = [1, 256], strides = [1, 1]} : vector<4x256xf32> to vector<1x256xf32>
    %7 = vector.broadcast %5 : vector<4x1xf32> to vector<4x256xf32>
    %8 = vector.broadcast %6 : vector<1x256xf32> to vector<4x256xf32>
    %9 = arith.mulf %7, %8 : vector<4x256xf32>
    %10 = arith.addf %4, %9 : vector<4x256xf32>
    %c0_6 = arith.constant 0 : index
    %c1 = arith.constant 1 : index
    %11 = vector.load %arg3[%c0_6, %c1] : memref<4x4xf32, #tpu.memory_space<vmem>>, vector<4x1xf32>
    %12 = vector.extract_strided_slice %1 {offsets = [1, 0], sizes = [1, 256], strides = [1, 1]} : vector<4x256xf32> to vector<1x256xf32>
    %13 = vector.broadcast %11 : vector<4x1xf32> to vector<4x256xf32>
    %14 = vector.broadcast %12 : vector<1x256xf32> to vector<4x256xf32>
    %15 = arith.mulf %13, %14 : vector<4x256xf32>
    %16 = arith.addf %10, %15 : vector<4x256xf32>
    %c0_7 = arith.constant 0 : index
    %c2 = arith.constant 2 : index
    %17 = vector.load %arg3[%c0_7, %c2] : memref<4x4xf32, #tpu.memory_space<vmem>>, vector<4x1xf32>
    %18 = vector.extract_strided_slice %1 {offsets = [2, 0], sizes = [1, 256], strides = [1, 1]} : vector<4x256xf32> to vector<1x256xf32>
    %19 = vector.broadcast %17 : vector<4x1xf32> to vector<4x256xf32>
    %20 = vector.broadcast %18 : vector<1x256xf32> to vector<4x256xf32>
    %21 = arith.mulf %19, %20 : vector<4x256xf32>
    %22 = arith.addf %16, %21 : vector<4x256xf32>
    %c0_8 = arith.constant 0 : index
    %c3 = arith.constant 3 : index
    %23 = vector.load %arg3[%c0_8, %c3] : memref<4x4xf32, #tpu.memory_space<vmem>>, vector<4x1xf32>
    %24 = vector.extract_strided_slice %1 {offsets = [3, 0], sizes = [1, 256], strides = [1, 1]} : vector<4x256xf32> to vector<1x256xf32>
    %25 = vector.broadcast %23 : vector<4x1xf32> to vector<4x256xf32>
    %26 = vector.broadcast %24 : vector<1x256xf32> to vector<4x256xf32>
    %27 = arith.mulf %25, %26 : vector<4x256xf32>
    %28 = arith.addf %22, %27 : vector<4x256xf32>
    %c0_9 = arith.constant 0 : index
    %c0_10 = arith.constant 0 : index
    %c0_11 = arith.constant 0 : index
    %29 = vector.load %arg5[%c0_9, %c0_10, %c0_11] : memref<1x4x256xf32, #tpu.memory_space<vmem>>, vector<1x4x256xf32>
    %30 = vector.shape_cast %29 : vector<1x4x256xf32> to vector<4x256xf32>
    %31 = vector.shape_cast %28 : vector<4x256xf32> to vector<1x4x256xf32>
    tpu.vector_store %arg5[%c0_9, %c0_10, %c0_11], %31 {strides = array<i32>} : memref<1x4x256xf32, #tpu.memory_space<vmem>>, vector<1x4x256xf32>,
    return
  }
  func.func @transform_0(%arg0: i32, %arg1: i32) -> (i32, i32, i32) {
    %c0_i32 = arith.constant 0 : i32
    %c0_i32_0 = arith.constant 0 : i32
    return %arg0, %c0_i32, %arg1 : i32, i32, i32
  }
  func.func @transform_1(%arg0: i32, %arg1: i32) -> (i32, i32) {
    %c0_i32 = arith.constant 0 : i32
    %c0_i32_0 = arith.constant 0 : i32
    %c0_i32_1 = arith.constant 0 : i32
    return %c0_i32, %c0_i32_0 : i32, i32
  }
  func.func @transform_2(%arg0: i32, %arg1: i32) -> (i32, i32) {
    %c0_i32 = arith.constant 0 : i32
    %c0_i32_0 = arith.constant 0 : i32
    %c0_i32_1 = arith.constant 0 : i32
    return %c0_i32, %c0_i32_0 : i32, i32
  }
  func.func @transform_3(%arg0: i32, %arg1: i32) -> (i32, i32, i32) {
    %c0_i32 = arith.constant 0 : i32
    %c0_i32_0 = arith.constant 0 : i32
    return %arg0, %c0_i32, %arg1 : i32, i32, i32
  }
}

</mosaic_0001>

<bundles_post_ra>
// kernel: tpu_custom_call.1
= control target key start
LH: loop header
LB: loop body
LE: loop exit
PB: predicated region body
PF: predicated region fallthrough
CT: control target
= control target key end

     0   :  { %8 = vsyncpa [#allocation3], 0  ;;  %s869_s0 = inlined_call_operand.hbm [shape: f32[2,4,256], index: 0, kind: input, shape index: {}]   ;;  %s870_s1 = inlined_call_operand.vmem [shape: f32[4,4], index: 1, kind: input, shape index: {}]   ;;  %s871_s2 = inlined_call_operand.vmem [shape: f32[4,1], index: 2, kind: input, shape index: {}]   ;;  %s872_s3 = inlined_call_operand.hbm [shape: f32[2,4,256], index: 3, kind: output, shape index: {}]  }
   0x1   :  { %10 = vsyncpa [#allocation3 + $0x1], 0 }
   0x2   :  { %11 = vsyncpa [#allocation4], 0 }
   0x3   :  { %13 = vsyncpa [#allocation4 + $0x1], 0  ;;  %s678_s12 = smov 0   ;;  %s680_s13 = smov 0  }
   0x4   :  { %s682_s14 = smov 0   ;;  %s684_s15 = smov 0  }
   0x5   :  { %s686_s16 = smov 0   ;;  %s688_s17 = smov 0  }
   0x6 LB: > { %s449_s18 = sadd.s32 4294967295, %s649_s17   ;;  %s450_s19 = sadd.s32 4294967294, %s649_s17   ;;  %s649_s17 = sphi %s688_s17, %s19_s17   ;;  %s645_s16 = sphi %s686_s16, %s888_s16   ;;  %s641_s15 = sphi %s684_s15, %s887_s15   ;;  %s637_s14 = sphi %s682_s14, %s886_s14   ;;  %s633_s13 = sphi %s680_s13, %s885_s13   ;;  %s629_s12 = sphi %s678_s12, %s884_s12  }
   0x7   : > { %s31_s20 = sadd.s32 1, %s645_s16  ;;  %s40_s21 = sadd.s32 1, %s637_s14 }
   0x8   : > { %p33_p0 = scmp.ge.s32.totalorder %s31_s20, 2  ;;  %p47_p1 = scmp.ne.s32.totalorder %s637_s14, %s633_s13 }
   0x9   : > { %p48_p2 = scmp.eq.s32.totalorder %s649_s17, 0  ;;  %p53_p3 = scmp.ne.s32.totalorder %s633_s13, %s629_s12 }
   0xa   : > { %s890_s20 = smov (%p33_p0, %s31_s20), 0  ;;  %p54_p5 = scmp.eq.s32.totalorder %s449_s18, 0 }
   0xb   : > { %p719_p4 = por %p48_p2, %p47_p1  ;;  %s35_s23 = ssub.s32 %s645_s16, %s890_s20 }
   0xc   : > { %p121_p6 = scmp.eq.s32.totalorder %s449_s18, 1  ;;  %p38_p7 = scmp.eq.s32.totalorder %s35_s23, 0 }
   0xd   : > { %p725_p8 = por %p54_p5, %p53_p3  ;;  %p127_p10 = scmp.eq.s32.totalorder %s450_s19, 1 }
   0xe   : > { %p729_p9 = por %p121_p6, %p47_p1  ;;  %p478_p13 = scmp.lt.s32.totalorder %s649_s17, 2 }
   0xf   : > { %s734_s26 = scalar_select %p38_p7, %s637_s14, %s40_s21  }
  0x10   : > { %s876_s25 = scalar_select %p729_p9, 1, 0 }
  0x11   : > { %p736_p11 = por %p127_p10, %p53_p3  ;;  %s153_s28 = sand.u32 1, %s637_s14  }
  0x12   : > { %s453_s29 = sshll.u32 %s153_s28, 3  ;;  %s464_s30 = sshll.u32 %s645_s16, 7 }
  0x13   : > { %s877_s27 = scalar_select %p736_p11, 1, 0 }
  0x14   : > { %s747_s6 = scalar_lea.hbm %s869_s0, %s464_s30  ;;  %s157_s7 = scalar_lea.vmem [#allocation2], %s453_s29 }
  0x15   : > { %s167_s8 = sshll.u32 %s157_s7, 4  ;;  %p753_p0 = pnand %p478_p13, %p719_p4  ;;  %s749_s8 = int_to_ptr.vmem [resolvable:$true] %s167_s8 }
  0x16   : > { %s154_s10 = scalar_lea.sflag [#allocation3], %s153_s28  ;;  %s537_s11 = scalar_lea.hbm %s747_s6, 128 }
  0x17   : > { %p538_p3 = scmp.ne.s32.totalorder %s747_s6, %s537_s11  ;;  %p539_p5 = pneg %p753_p0 }
  0x18   : > { %s542_s21 = scalar_lea.hbm %s869_s0, 256  ;;  %p543_p4 = scmp.lt.u32.totalorder %s747_s6, %s869_s0 }
  0x19   : > { %p540_p6 = pnand %p539_p5, %p538_p3  ;;  %p544_p10 = scmp.lt.u32.totalorder %s542_s21, %s537_s11 }
  0x1a   : > { %p546_p12 = scmp.lt.u32.totalorder %s537_s11, %s747_s6 }
  0x1b   : > { %p541_p7 = pneg %p540_p6  ;;  %p545_p13 = por %p544_p10, %p543_p4 }
  0x1d   : > { %p547_p1 = por %p546_p12, %p545_p13 }
  0x1f   : > { %p548_p2 = pnand %p547_p1, %p541_p7 }
  0x21   : > { %551 = shalt.err (!%p548_p2)
}
  0x22   : > { %s552_s28 = scalar_lea.vmem %s749_s8, 128  ;;  %s651_s29 = smov [#allocation2]  }
  0x23   : > { %p553_p3 = scmp.ne.s32.totalorder %s749_s8, %s552_s28  ;;  %s557_s30 = sshll.u32 %s651_s29, 4  ;;  %s558_s30 = int_to_ptr.vmem [resolvable:$false] %s557_s30 }
  0x24   : > { %s559_s4 = scalar_lea.vmem %s558_s30, 256  ;;  %p560_p9 = scmp.lt.s32.totalorder %s749_s8, %s558_s30 }
  0x25   : > { %p555_p6 = pnand %p553_p3, %p539_p5  ;;  %p561_p4 = scmp.lt.s32.totalorder %s559_s4, %s552_s28 }
  0x27   : > { %p556_p11 = pneg %p555_p6  ;;  %p562_p10 = por %p561_p4, %p560_p9 }
  0x29   : > { %p563_p12 = pnand %p562_p10, %p556_p11 }
  0x2b   : > { %566 = shalt.err (!%p563_p12)
}
  0x2c   : > { %473 = dma.hbm_to_vmem [thread:$0]  (!%p753_p0), %s747_s6, 128, %s749_s8, %s154_s10  }
  0x2d   : > { %p879_p1 = scmp.lt.s32.totalorder %s649_s17, 3  ;;  %p880_p2 = scmp.ge.s32.totalorder %s649_s17, 1 }
  0x2f   : > { %p173_p5 = pnand %p880_p2, %p879_p1 }
  0x30   : > { %s789_s5 = sand.u32 (!%p173_p5), 1, %s633_s13  }
  0x31   : > { %176 = sbr.rel (%p173_p5) target bundleno = 217 (0xd9), region = 32  ;;  %s457_s7 = sshll.u32 (!%p173_p5), %s789_s5, 3 }
  0x32   : > { %s179_s11 = scalar_lea.sflag (!%p173_p5), [#allocation3], %s789_s5  ;;  %s182_s9 = scalar_lea.vmem (!%p173_p5), [#allocation2], %s457_s7 }
  0x38   : > { %620 = dma.done.wait (%p725_p8), %s179_s11, 128  }
  0x39   : > { %622 = vsyncadd (%p725_p8), %s179_s11, 4294967168  ;;  %v652_v0 = vmov 0   ;;  %v653_v1 = vmov 1   ;;  %v208_v2 = vld [vmem:[%s871_s2] sm:$0xf]  ;;  %v654_v6 = vmov 2   ;;  %v216_v9 = vlaneseq }
  0x3a   : > { %533 = vset.pattern.permute.xlu0 %v652_v0  ;;  %534 = vset.pattern.permute.xlu1 %v653_v1  ;;  %v254_v3 = vld [vmem:[%s870_s1] sm:$0xf]  ;;  %v655_v8 = vmov 3   ;;  %v656_v11 = vmov 839922192   ;;  %s465_s29 = sshll.u32 %s641_s15, 7 }
  0x3b   : > { %211 = vperm.xlu0 %533, %v208_v2   ;;  %257 = vperm.xlu1 %534, %v254_v3   ;;  %v222_v4 = vld [vmem:[%s870_s1] sm:$0xf]  ;;  %v217_v10 = vshrl.u32 %v216_v9, 7  ;;  %v214_v12 = vunpack.c.l.s4 %v656_v11  ;;  %s204_s30 = scalar_lea.vmem [#allocation5], %s457_s7  ;;  %s820_s6 = scalar_lea.hbm %s872_s3, %s465_s29 }
  0x3c   : > { %v285_v5 = vld [vmem:[%s870_s1] sm:$0xf]  ;;  %s365_s4 = sshll.u32 %s204_s30, 4  ;;  %s349_s8 = scalar_lea.sflag [#allocation4], %s789_s5  ;;  %s822_s4 = int_to_ptr.vmem [resolvable:$true] %s365_s4 }
  0x3d   : > { %v316_v7 = vld [vmem:[%s870_s1] sm:$0xf]  ;;  %v262_v13 = vsub.s32 1, %v217_v10  ;;  %v266_v14 = vsub.s32 5, %v217_v10  ;;  %v231_v15 = vsub.s32 0, %v217_v10  ;;  %v235_v16 = vsub.s32 4, %v217_v10 }
  0x3e   : > { %v207_v17 = vld [vmem:[%s182_s9] sm:$0xff]  ;;  %v293_v18 = vsub.s32 2, %v217_v10  ;;  %v297_v19 = vsub.s32 6, %v217_v10  ;;  %v215_v20 = vunpack.c.0.s8 %v214_v12  ;;  %v324_v27 = vsub.s32 3, %v217_v10  ;;  %s567_s10 = scalar_lea.vmem %s822_s4, 128  ;;  %p881_p9 = scmp.ne.s32.totalorder %s876_s25, 0 }
  0x3f   : > { %225 = vperm.xlu0 %533, %v222_v4   ;;  %535 = vset.pattern.permute.xlu1 %v654_v6  ;;  %v263_v21 = vrot.slane %v207_v17, %v262_v13  ;;  %v267_v22 = vrot.slane %v207_v17, %v266_v14  ;;  %v232_v23 = vrot.slane %v207_v17, %v231_v15  ;;  %v328_v28 = vsub.s32 7, %v217_v10  ;;  %p568_p8 = scmp.ne.s32.totalorder %s822_s4, %s567_s10  ;;  %s657_s15 = smov [#allocation5]  }
  0x40   : > { %288 = vperm.xlu1 %535, %v285_v5   ;;  %v236_v24 = vrot.slane %v207_v17, %v235_v16  ;;  %v294_v25 = vrot.slane %v207_v17, %v293_v18  ;;  %v298_v26 = vrot.slane %v207_v17, %v297_v19  ;;  %v218_v29 = vsub.s32 %v215_v20, %v217_v10  ;;  %s571_s7 = sshll.u32 %s657_s15, 4  ;;  %s572_s7 = int_to_ptr.vmem [resolvable:$false] %s571_s7 }
  0x41   : > { %v273_v32 = vrot.slane %v263_v21, %v262_v13  ;;  %v277_v33 = vrot.slane %v267_v22, %v262_v13  ;;  %v242_v34 = vrot.slane %v232_v23, %v231_v15  ;;  %v325_v38 = vrot.slane %v207_v17, %v324_v27  ;;  %p569_p11 = pnand %p568_p8, %p881_p9  ;;  %s573_s18 = scalar_lea.vmem %s572_s7, 256 }
  0x42   : > { %v246_v35 = vrot.slane %v236_v24, %v231_v15  ;;  %v304_v36 = vrot.slane %v294_v25, %v293_v18  ;;  %v308_v37 = vrot.slane %v298_v26, %v293_v18  ;;  %v329_v39 = vrot.slane %v207_v17, %v328_v28  ;;  %p574_p7 = scmp.lt.s32.totalorder %s822_s4, %s572_s7  ;;  %p575_p13 = scmp.lt.s32.totalorder %s573_s18, %s567_s10 }
  0x43   : > { %536 = vset.pattern.permute.xlu0 %v655_v8  ;;  %v335_v49 = vrot.slane %v325_v38, %v324_v27  ;;  %p570_p0 = pneg %p569_p11 }
  0x44   : > { %319 = vperm.xlu0 %536, %v316_v7   ;;  %v339_v50 = vrot.slane %v329_v39, %v324_v27  ;;  %p576_p3 = por %p575_p13, %p574_p7 }
  0x46   : > { %p577_p6 = pnand %p576_p3, %p570_p0 }
  0xba   : > { %v212_v30 = vpop.permute.xlu0 %211  ;;  %v258_v31 = vpop.permute.xlu1 %257 }
  0xbb   : > { %v219_v40 = vrot.slane %v212_v30, %v218_v29  ;;  %v278_v42 = vmul.f32 %v273_v32, %v258_v31  ;;  %v279_v43 = vmul.f32 %v277_v33, %v258_v31 }
  0xbd   : > { %v221_v51 = vadd.f32 %v219_v40, %v207_v17  ;;  %v282_v53 = vcombine.low %v278_v42, %v279_v43 }
  0xbe   : > { %v226_v41 = vpop.permute.xlu0 %225 }
  0xbf   : > { %v247_v44 = vmul.f32 %v242_v34, %v226_v41  ;;  %v248_v45 = vmul.f32 %v246_v35, %v226_v41  ;;  %v289_v46 = vpop.permute.xlu1 %288 }
  0xc0   : > { %v309_v47 = vmul.f32 %v304_v36, %v289_v46  ;;  %v310_v48 = vmul.f32 %v308_v37, %v289_v46 }
  0xc1   : > { %v251_v52 = vcombine.low %v247_v44, %v248_v45 }
  0xc2   : > { %v313_v55 = vcombine.low %v309_v47, %v310_v48 }
  0xc3   : > { %v253_v54 = vadd.f32 %v251_v52, %v221_v51  ;;  %v320_v56 = vpop.permute.xlu0 %319 }
  0xc4   : > { %v340_v57 = vmul.f32 %v335_v49, %v320_v56  ;;  %v341_v58 = vmul.f32 %v339_v50, %v320_v56 }
  0xc5   : > { %v284_v59 = vadd.f32 %v282_v53, %v253_v54 }
  0xc6   : > { %v344_v60 = vcombine.low %v340_v57, %v341_v58 }
  0xc7   : > { %v315_v61 = vadd.f32 %v313_v55, %v284_v59 }
  0xc9   : > { %v346_v62 = vadd.f32 %v344_v60, %v315_v61 }
  0xcb   : > { %347 = vst [vmem:[%s204_s30] sm:$0xff] %v346_v62 }
  0xcc   : > { %580 = shalt.err (!%p577_p6)
}
  0xcd   : > { %s581_s5 = scalar_lea.hbm %s820_s6, 128  ;;  %s585_s24 = scalar_lea.hbm %s872_s3, 256 }
  0xce   : > { %p582_p4 = scmp.ne.s32.totalorder %s820_s6, %s581_s5  ;;  %p586_p1 = scmp.lt.u32.totalorder %s820_s6, %s872_s3 }
  0xcf   : > { %p587_p2 = scmp.lt.u32.totalorder %s585_s24, %s581_s5  ;;  %p589_p8 = scmp.lt.u32.totalorder %s581_s5, %s820_s6 }
  0xd0   : > { %p583_p10 = pnand %p582_p4, %p881_p9 }
  0xd1   : > { %p588_p5 = por %p587_p2, %p586_p1 }
  0xd2   : > { %p584_p12 = pneg %p583_p10 }
  0xd3   : > { %p590_p11 = por %p589_p8, %p588_p5 }
  0xd5   : > { %p591_p0 = pnand %p590_p11, %p584_p12 }
  0xd7   : > { %594 = shalt.err (!%p591_p0)
}
  0xd8   : > { %468 = dma.vmem_to_hbm [thread:$0]  (%p881_p9), %s822_s4, 128, %s820_s6, %s349_s8  }
  0xd9 PF: > { %s377_s28 = sand.u32 1, %s629_s12   ;;  %p882_p7 = scmp.ne.s32.totalorder %s877_s27, 0 }
  0xda   : > { %p883_p13 = scmp.ge.s32.totalorder %s649_s17, 2  ;;  %s378_s29 = scalar_lea.sflag [#allocation4], %s377_s28 }
  0xdc   : > { %p475_p3 = pnand %p883_p13, %p882_p7 }
  0xde   : > { %624 = dma.done.wait (!%p475_p3), %s378_s29, 128  }
  0xdf   : > { %626 = vsyncadd (!%p475_p3), %s378_s29, 4294967168  ;;  %s19_s17 = sadd.s32 1, %s649_s17   ;;  %s884_s12 = smov %s633_s13 }
  0xe0   : > { %p16_p6 = scmp.ge.s32.totalorder %s19_s17, 4   ;;  %s885_s13 = smov %s637_s14 }
  0xe1   : > { %s886_s14 = smov %s734_s26  ;;  %s887_s15 = smov %s645_s16 }
  0xe2   : > { %s888_s16 = smov %s890_s20  ;;  %18 = sbr.rel (!%p16_p6) target bundleno = 6 (0x6), region = 77 }
  0xe9   :  { %383 = vsyncpa [#allocation3], 1 }
  0xea   :  { %385 = vsyncpa [#allocation3 + $0x1], 1 }
  0xeb   :  { %386 = vsyncpa [#allocation4], 1 }
  0xec   :  { %388 = vsyncpa [#allocation4 + $0x1], 1 }

</bundles_post_ra>
